<compile_context>
chip_gen: v5e
topology: v5e:2x2
jax: 0.10.0
libtpu: 0.0.40
codegen_flags: <defaults>
</compile_context>

<pallas_src>
import numpy as np
import jax
import jax.numpy as jnp
from jax import lax
from jax.experimental import pallas as pl
from jax.experimental.pallas import tpu as pltpu

_TAPS = [(kh, kw) for kh in range(3) for kw in range(3)]


def _build_tap_masks(H, W, L):
    """(9, 1, L) f32 validity masks; periodic per image (period H*W), so cross-image
    leakage from whole-slab lane rolls is zeroed as well as image-border taps."""
    HW = H * W
    pos = np.arange(L)
    pim = pos % HW
    xc = pim % W
    yc = pim // W
    masks = np.zeros((9, 1, L), np.float32)
    for tap, (kh, kw) in enumerate(_TAPS):
        dy, dx = kh - 1, kw - 1
        m = np.ones(L, dtype=bool)
        if dy == -1:
            m &= yc >= 1
        if dy == 1:
            m &= yc <= H - 2
        if dx == -1:
            m &= xc >= 1
        if dx == 1:
            m &= xc <= W - 2
        masks[tap, 0, :] = m.astype(np.float32)
    return jnp.asarray(masks)


def _choose_batch_block(N, HW, max_lanes=16384):
    """Images per grid step: largest divisor of N that fits the lane budget and keeps
    >= 2 grid steps (feed both v7x TensorCores) whenever N >= 2."""
    best = 1
    for B in range(1, N + 1):
        if N % B:
            continue
        if B * HW > max_lanes:
            continue
        if N >= 2 and (N // B) < 2:
            continue
        best = B
    return best


def _make_resblock_kernel(H, W, C, P, L):
    def conv3x3(h, w_ref, b_ref, mask_ref, patch_ref):
        """3x3 'same' conv on a lane-dense (C, L) slab via im2col + one MXU matmul."""
        for tap, (kh, kw) in enumerate(_TAPS):
            delta = (kh - 1) * W + (kw - 1)
            if delta == 0:
                patch_ref[tap * C:(tap + 1) * C, :] = h               # center tap
            else:
                rolled = pltpu.roll(h, (-delta) % L, axis=1)          # lane roll (XLU)
                patch_ref[tap * C:(tap + 1) * C, :] = rolled * mask_ref[tap]
        # (P, 9*C) @ (9*C, L) on the MXU, f32 accumulate, plus bias column.
        return jnp.dot(w_ref[...], patch_ref[...],
                       preferred_element_type=jnp.float32) + b_ref[...]

    def kernel(mask_ref, x_ref, w1_ref, b1_ref, w2_ref, b2_ref, o_ref, patch_ref):
        x = x_ref[...]                                                # (C, L) slab
        h1 = jnp.maximum(x, 0.0)                                      # relu(x)
        a1 = conv3x3(h1, w1_ref, b1_ref, mask_ref, patch_ref)         # conv1 + bias
        h2 = jnp.maximum(a1, 0.0)                                     # relu
        a2 = conv3x3(h2, w2_ref, b2_ref, mask_ref, patch_ref)         # conv2 + bias
        o_ref[...] = a2 + x                                           # identity shortcut

    return kernel


def resblock_forward(x_nchw, w1, b1, w2, b2):
    """x: (N, C, H, W) f32; w1/w2 HWIO (3, 3, Cin, Cout); returns (N, P, H, W)."""
    N, C, H, W = x_nchw.shape
    P = w1.shape[-1]
    assert C == P, "identity shortcut requires in_planes == planes"
    HW = H * W
    B = _choose_batch_block(N, HW)
    G = N // B
    L = B * HW

    # Channel-major lane-dense layout (single XLA transpose outside the kernel).
    x_cm = jnp.transpose(x_nchw.reshape(N, C, HW), (1, 0, 2)).reshape(C, N * HW)
    w1_mat = w1.reshape(9 * C, P).T                                   # (P, 9*C), col = tap*C + cin
    w2_mat = w2.reshape(9 * P, P).T                                   # (P, 9*P)
    b1_col = b1.reshape(P, 1)
    b2_col = b2.reshape(P, 1)
    masks = _build_tap_masks(H, W, L)                                 # (9, 1, L), grid-invariant

    kernel = _make_resblock_kernel(H, W, C, P, L)
    out_cm = pl.pallas_call(
        kernel,
        out_shape=jax.ShapeDtypeStruct((P, N * HW), jnp.float32),
        grid_spec=pltpu.PrefetchScalarGridSpec(
            num_scalar_prefetch=0,
            grid=(G,),
            in_specs=[
                pl.BlockSpec((9, 1, L), lambda g: (0, 0, 0)),         # masks: resident in VMEM
                pl.BlockSpec((C, L), lambda g: (0, g)),               # B images per step
                pl.BlockSpec((P, 9 * C), lambda g: (0, 0)),           # conv1 weights: resident
                pl.BlockSpec((P, 1), lambda g: (0, 0)),
                pl.BlockSpec((P, 9 * P), lambda g: (0, 0)),           # conv2 weights: resident
                pl.BlockSpec((P, 1), lambda g: (0, 0)),
            ],
            out_specs=pl.BlockSpec((P, L), lambda g: (0, g)),
            scratch_shapes=[pltpu.VMEM((9 * C, L), jnp.float32)],     # im2col patch slab
        ),
        compiler_params=pltpu.CompilerParams(
            dimension_semantics=("parallel",)),
    )(masks, x_cm, w1_mat, b1_col, w2_mat, b2_col)

    return out_cm.reshape(P, N, HW).transpose(1, 0, 2).reshape(N, P, H, W)


def _reference_forward(x_nchw, w1, b1, w2, b2):
    """Pure-JAX reference (NCHW, HWIO weights) mirroring the PyTorch forward."""
    dn = lax.conv_dimension_numbers(x_nchw.shape, w1.shape, ("NCHW", "HWIO", "NCHW"))
    out = jax.nn.relu(x_nchw)
    out = lax.conv_general_dilated(out, w1, (1, 1), ((1, 1), (1, 1)), dimension_numbers=dn)
    out = jax.nn.relu(out + b1.reshape(1, -1, 1, 1))
    out = lax.conv_general_dilated(out, w2, (1, 1), ((1, 1), (1, 1)), dimension_numbers=dn)
    out = out + b2.reshape(1, -1, 1, 1)
    return out + x_nchw


if __name__ == "__main__":
    N, C, H, W = 2, 4, 16, 16
    planes = C  # identity shortcut path (stride=1, in_planes == planes, bn=False)

    key = jax.random.PRNGKey(0)
    k1, k2, k3, k4, k5 = jax.random.split(key, 5)
    x = jax.random.normal(k1, (N, C, H, W), dtype=jnp.float32)
    w1 = jax.random.normal(k2, (3, 3, C, planes), dtype=jnp.float32) * 0.1   # HWIO
    b1 = jax.random.normal(k3, (planes,), dtype=jnp.float32) * 0.1
    w2 = jax.random.normal(k4, (3, 3, planes, planes), dtype=jnp.float32) * 0.1
    b2 = jax.random.normal(k5, (planes,), dtype=jnp.float32) * 0.1

    out = resblock_forward(x, w1, b1, w2, b2)
    out = jax.block_until_ready(out)

    ref = jax.block_until_ready(_reference_forward(x, w1, b1, w2, b2))
    if not np.allclose(np.asarray(out), np.asarray(ref), atol=1e-4, rtol=1e-4):
        raise AssertionError("Pallas ResBlock output does not match reference")

    print("KERNEL_OK")
</pallas_src>

<mosaic_0001>
module attributes {stable_mosaic.version = 11 : i64} {
  func.func @kernel(%arg0: i32, %arg1: memref<9x1x256xf32, #tpu.memory_space<vmem>>, %arg2: memref<4x256xf32, #tpu.memory_space<vmem>>, %arg3: memref<4x36xf32, #tpu.memory_space<vmem>>, %arg4: memref<4x1xf32, #tpu.memory_space<vmem>>, %arg5: memref<4x36xf32, #tpu.memory_space<vmem>>, %arg6: memref<4x1xf32, #tpu.memory_space<vmem>>, %arg7: memref<4x256xf32, #tpu.memory_space<vmem>>, %arg8: memref<36x256xf32, #tpu.memory_space<vmem>>) attributes {dimension_semantics = [#tpu.dimension_semantics<parallel>], iteration_bounds = array<i64: 2>, scalar_prefetch = 0 : i64, scratch_operands = 1 : i64, tpu.core_type = #tpu.core_type<tc>, window_params = [{pipeline_mode = #tpu.pipeline_mode<synchronous>, transform_indices = @transform_0, window_bounds = array<i64: 9, 1, 256>}, {transform_indices = @transform_1, window_bounds = array<i64: 4, 256>}, {pipeline_mode = #tpu.pipeline_mode<synchronous>, transform_indices = @transform_2, window_bounds = array<i64: 4, 36>}, {pipeline_mode = #tpu.pipeline_mode<synchronous>, transform_indices = @transform_3, window_bounds = array<i64: 4, 1>}, {pipeline_mode = #tpu.pipeline_mode<synchronous>, transform_indices = @transform_4, window_bounds = array<i64: 4, 36>}, {pipeline_mode = #tpu.pipeline_mode<synchronous>, transform_indices = @transform_5, window_bounds = array<i64: 4, 1>}, {transform_indices = @transform_6, window_bounds = array<i64: 4, 256>}]} {
    %c0 = arith.constant 0 : index
    %c0_0 = arith.constant 0 : index
    %0 = vector.load %arg2[%c0, %c0_0] : memref<4x256xf32, #tpu.memory_space<vmem>>, vector<4x256xf32>
    %cst = arith.constant 0.000000e+00 : f32
    %1 = vector.broadcast %cst : f32 to vector<4x256xf32>
    %2 = arith.maximumf %0, %1 : vector<4x256xf32>
    %c17_i32 = arith.constant 17 : i32
    %3 = tpu.dynamic_rotate %2 by %c17_i32 dim 1 : vector<4x256xf32>, i32 -> vector<4x256xf32>
    %c0_1 = arith.constant 0 : index
    %c0_2 = arith.constant 0 : index
    %c0_3 = arith.constant 0 : index
    %4 = vector.load %arg1[%c0_1, %c0_2, %c0_3] : memref<9x1x256xf32, #tpu.memory_space<vmem>>, vector<1x1x256xf32>
    %5 = vector.shape_cast %4 : vector<1x1x256xf32> to vector<1x256xf32>
    %6 = vector.broadcast %5 : vector<1x256xf32> to vector<4x256xf32>
    %7 = arith.mulf %3, %6 : vector<4x256xf32>
    %c0_4 = arith.constant 0 : index
    %c0_5 = arith.constant 0 : index
    %8 = vector.load %arg8[%c0_4, %c0_5] : memref<36x256xf32, #tpu.memory_space<vmem>>, vector<4x256xf32>
    tpu.vector_store %arg8[%c0_4, %c0_5], %7 {strides = array<i32>} : memref<36x256xf32, #tpu.memory_space<vmem>>, vector<4x256xf32>,
    %c16_i32 = arith.constant 16 : i32
    %9 = tpu.dynamic_rotate %2 by %c16_i32 dim 1 : vector<4x256xf32>, i32 -> vector<4x256xf32>
    %c1 = arith.constant 1 : index
    %c0_6 = arith.constant 0 : index
    %c0_7 = arith.constant 0 : index
    %10 = vector.load %arg1[%c1, %c0_6, %c0_7] : memref<9x1x256xf32, #tpu.memory_space<vmem>>, vector<1x1x256xf32>
    %11 = vector.shape_cast %10 : vector<1x1x256xf32> to vector<1x256xf32>
    %12 = vector.broadcast %11 : vector<1x256xf32> to vector<4x256xf32>
    %13 = arith.mulf %9, %12 : vector<4x256xf32>
    %c4 = arith.constant 4 : index
    %c0_8 = arith.constant 0 : index
    %14 = vector.load %arg8[%c4, %c0_8] : memref<36x256xf32, #tpu.memory_space<vmem>>, vector<4x256xf32>
    tpu.vector_store %arg8[%c4, %c0_8], %13 {strides = array<i32>} : memref<36x256xf32, #tpu.memory_space<vmem>>, vector<4x256xf32>,
    %c15_i32 = arith.constant 15 : i32
    %15 = tpu.dynamic_rotate %2 by %c15_i32 dim 1 : vector<4x256xf32>, i32 -> vector<4x256xf32>
    %c2 = arith.constant 2 : index
    %c0_9 = arith.constant 0 : index
    %c0_10 = arith.constant 0 : index
    %16 = vector.load %arg1[%c2, %c0_9, %c0_10] : memref<9x1x256xf32, #tpu.memory_space<vmem>>, vector<1x1x256xf32>
    %17 = vector.shape_cast %16 : vector<1x1x256xf32> to vector<1x256xf32>
    %18 = vector.broadcast %17 : vector<1x256xf32> to vector<4x256xf32>
    %19 = arith.mulf %15, %18 : vector<4x256xf32>
    %c8 = arith.constant 8 : index
    %c0_11 = arith.constant 0 : index
    %20 = vector.load %arg8[%c8, %c0_11] : memref<36x256xf32, #tpu.memory_space<vmem>>, vector<4x256xf32>
    tpu.vector_store %arg8[%c8, %c0_11], %19 {strides = array<i32>} : memref<36x256xf32, #tpu.memory_space<vmem>>, vector<4x256xf32>,
    %c1_i32 = arith.constant 1 : i32
    %21 = tpu.dynamic_rotate %2 by %c1_i32 dim 1 : vector<4x256xf32>, i32 -> vector<4x256xf32>
    %c3 = arith.constant 3 : index
    %c0_12 = arith.constant 0 : index
    %c0_13 = arith.constant 0 : index
    %22 = vector.load %arg1[%c3, %c0_12, %c0_13] : memref<9x1x256xf32, #tpu.memory_space<vmem>>, vector<1x1x256xf32>
    %23 = vector.shape_cast %22 : vector<1x1x256xf32> to vector<1x256xf32>
    %24 = vector.broadcast %23 : vector<1x256xf32> to vector<4x256xf32>
    %25 = arith.mulf %21, %24 : vector<4x256xf32>
    %c12 = arith.constant 12 : index
    %c0_14 = arith.constant 0 : index
    %26 = vector.load %arg8[%c12, %c0_14] : memref<36x256xf32, #tpu.memory_space<vmem>>, vector<4x256xf32>
    tpu.vector_store %arg8[%c12, %c0_14], %25 {strides = array<i32>} : memref<36x256xf32, #tpu.memory_space<vmem>>, vector<4x256xf32>,
    %c16 = arith.constant 16 : index
    %c0_15 = arith.constant 0 : index
    %27 = vector.load %arg8[%c16, %c0_15] : memref<36x256xf32, #tpu.memory_space<vmem>>, vector<4x256xf32>
    tpu.vector_store %arg8[%c16, %c0_15], %2 {strides = array<i32>} : memref<36x256xf32, #tpu.memory_space<vmem>>, vector<4x256xf32>,
    %c255_i32 = arith.constant 255 : i32
    %28 = tpu.dynamic_rotate %2 by %c255_i32 dim 1 : vector<4x256xf32>, i32 -> vector<4x256xf32>
    %c5 = arith.constant 5 : index
    %c0_16 = arith.constant 0 : index
    %c0_17 = arith.constant 0 : index
    %29 = vector.load %arg1[%c5, %c0_16, %c0_17] : memref<9x1x256xf32, #tpu.memory_space<vmem>>, vector<1x1x256xf32>
    %30 = vector.shape_cast %29 : vector<1x1x256xf32> to vector<1x256xf32>
    %31 = vector.broadcast %30 : vector<1x256xf32> to vector<4x256xf32>
    %32 = arith.mulf %28, %31 : vector<4x256xf32>
    %c20 = arith.constant 20 : index
    %c0_18 = arith.constant 0 : index
    %33 = vector.load %arg8[%c20, %c0_18] : memref<36x256xf32, #tpu.memory_space<vmem>>, vector<4x256xf32>
    tpu.vector_store %arg8[%c20, %c0_18], %32 {strides = array<i32>} : memref<36x256xf32, #tpu.memory_space<vmem>>, vector<4x256xf32>,
    %c241_i32 = arith.constant 241 : i32
    %34 = tpu.dynamic_rotate %2 by %c241_i32 dim 1 : vector<4x256xf32>, i32 -> vector<4x256xf32>
    %c6 = arith.constant 6 : index
    %c0_19 = arith.constant 0 : index
    %c0_20 = arith.constant 0 : index
    %35 = vector.load %arg1[%c6, %c0_19, %c0_20] : memref<9x1x256xf32, #tpu.memory_space<vmem>>, vector<1x1x256xf32>
    %36 = vector.shape_cast %35 : vector<1x1x256xf32> to vector<1x256xf32>
    %37 = vector.broadcast %36 : vector<1x256xf32> to vector<4x256xf32>
    %38 = arith.mulf %34, %37 : vector<4x256xf32>
    %c24 = arith.constant 24 : index
    %c0_21 = arith.constant 0 : index
    %39 = vector.load %arg8[%c24, %c0_21] : memref<36x256xf32, #tpu.memory_space<vmem>>, vector<4x256xf32>
    tpu.vector_store %arg8[%c24, %c0_21], %38 {strides = array<i32>} : memref<36x256xf32, #tpu.memory_space<vmem>>, vector<4x256xf32>,
    %c240_i32 = arith.constant 240 : i32
    %40 = tpu.dynamic_rotate %2 by %c240_i32 dim 1 : vector<4x256xf32>, i32 -> vector<4x256xf32>
    %c7 = arith.constant 7 : index
    %c0_22 = arith.constant 0 : index
    %c0_23 = arith.constant 0 : index
    %41 = vector.load %arg1[%c7, %c0_22, %c0_23] : memref<9x1x256xf32, #tpu.memory_space<vmem>>, vector<1x1x256xf32>
    %42 = vector.shape_cast %41 : vector<1x1x256xf32> to vector<1x256xf32>
    %43 = vector.broadcast %42 : vector<1x256xf32> to vector<4x256xf32>
    %44 = arith.mulf %40, %43 : vector<4x256xf32>
    %c28 = arith.constant 28 : index
    %c0_24 = arith.constant 0 : index
    %45 = vector.load %arg8[%c28, %c0_24] : memref<36x256xf32, #tpu.memory_space<vmem>>, vector<4x256xf32>
    tpu.vector_store %arg8[%c28, %c0_24], %44 {strides = array<i32>} : memref<36x256xf32, #tpu.memory_space<vmem>>, vector<4x256xf32>,
    %c239_i32 = arith.constant 239 : i32
    %46 = tpu.dynamic_rotate %2 by %c239_i32 dim 1 : vector<4x256xf32>, i32 -> vector<4x256xf32>
    %c8_25 = arith.constant 8 : index
    %c0_26 = arith.constant 0 : index
    %c0_27 = arith.constant 0 : index
    %47 = vector.load %arg1[%c8_25, %c0_26, %c0_27] : memref<9x1x256xf32, #tpu.memory_space<vmem>>, vector<1x1x256xf32>
    %48 = vector.shape_cast %47 : vector<1x1x256xf32> to vector<1x256xf32>
    %49 = vector.broadcast %48 : vector<1x256xf32> to vector<4x256xf32>
    %50 = arith.mulf %46, %49 : vector<4x256xf32>
    %c32 = arith.constant 32 : index
    %c0_28 = arith.constant 0 : index
    %51 = vector.load %arg8[%c32, %c0_28] : memref<36x256xf32, #tpu.memory_space<vmem>>, vector<4x256xf32>
    tpu.vector_store %arg8[%c32, %c0_28], %50 {strides = array<i32>} : memref<36x256xf32, #tpu.memory_space<vmem>>, vector<4x256xf32>,
    %c0_29 = arith.constant 0 : index
    %c0_30 = arith.constant 0 : index
    %52 = vector.load %arg3[%c0_29, %c0_30] : memref<4x36xf32, #tpu.memory_space<vmem>>, vector<4x36xf32>
    %c0_31 = arith.constant 0 : index
    %c0_32 = arith.constant 0 : index
    %53 = vector.load %arg8[%c0_31, %c0_32] : memref<36x256xf32, #tpu.memory_space<vmem>>, vector<36x256xf32>
    %cst_33 = arith.constant dense<0.000000e+00> : vector<4x256xf32>
    %54 = tpu.matmul %52, %53, %cst_33 {dimension_numbers = #tpu.dot_dimension_numbers<[1], [0], [0], [1], [0, 0, 1, 1], [], []>} : vector<4x36xf32>, vector<36x256xf32>, vector<4x256xf32> -> vector<4x256xf32>
    %c0_34 = arith.constant 0 : index
    %c0_35 = arith.constant 0 : index
    %55 = vector.load %arg4[%c0_34, %c0_35] : memref<4x1xf32, #tpu.memory_space<vmem>>, vector<4x1xf32>
    %56 = vector.broadcast %55 : vector<4x1xf32> to vector<4x256xf32>
    %57 = arith.addf %54, %56 : vector<4x256xf32>
    %cst_36 = arith.constant 0.000000e+00 : f32
    %58 = vector.broadcast %cst_36 : f32 to vector<4x256xf32>
    %59 = arith.maximumf %57, %58 : vector<4x256xf32>
    %c17_i32_37 = arith.constant 17 : i32
    %60 = tpu.dynamic_rotate %59 by %c17_i32_37 dim 1 : vector<4x256xf32>, i32 -> vector<4x256xf32>
    %c0_38 = arith.constant 0 : index
    %c0_39 = arith.constant 0 : index
    %c0_40 = arith.constant 0 : index
    %61 = vector.load %arg1[%c0_38, %c0_39, %c0_40] : memref<9x1x256xf32, #tpu.memory_space<vmem>>, vector<1x1x256xf32>
    %62 = vector.shape_cast %61 : vector<1x1x256xf32> to vector<1x256xf32>
    %63 = vector.broadcast %62 : vector<1x256xf32> to vector<4x256xf32>
    %64 = arith.mulf %60, %63 : vector<4x256xf32>
    %c0_41 = arith.constant 0 : index
    %c0_42 = arith.constant 0 : index
    %65 = vector.load %arg8[%c0_41, %c0_42] : memref<36x256xf32, #tpu.memory_space<vmem>>, vector<4x256xf32>
    tpu.vector_store %arg8[%c0_41, %c0_42], %64 {strides = array<i32>} : memref<36x256xf32, #tpu.memory_space<vmem>>, vector<4x256xf32>,
    %c16_i32_43 = arith.constant 16 : i32
    %66 = tpu.dynamic_rotate %59 by %c16_i32_43 dim 1 : vector<4x256xf32>, i32 -> vector<4x256xf32>
    %c1_44 = arith.constant 1 : index
    %c0_45 = arith.constant 0 : index
    %c0_46 = arith.constant 0 : index
    %67 = vector.load %arg1[%c1_44, %c0_45, %c0_46] : memref<9x1x256xf32, #tpu.memory_space<vmem>>, vector<1x1x256xf32>
    %68 = vector.shape_cast %67 : vector<1x1x256xf32> to vector<1x256xf32>
    %69 = vector.broadcast %68 : vector<1x256xf32> to vector<4x256xf32>
    %70 = arith.mulf %66, %69 : vector<4x256xf32>
    %c4_47 = arith.constant 4 : index
    %c0_48 = arith.constant 0 : index
    %71 = vector.load %arg8[%c4_47, %c0_48] : memref<36x256xf32, #tpu.memory_space<vmem>>, vector<4x256xf32>
    tpu.vector_store %arg8[%c4_47, %c0_48], %70 {strides = array<i32>} : memref<36x256xf32, #tpu.memory_space<vmem>>, vector<4x256xf32>,
    %c15_i32_49 = arith.constant 15 : i32
    %72 = tpu.dynamic_rotate %59 by %c15_i32_49 dim 1 : vector<4x256xf32>, i32 -> vector<4x256xf32>
    %c2_50 = arith.constant 2 : index
    %c0_51 = arith.constant 0 : index
    %c0_52 = arith.constant 0 : index
    %73 = vector.load %arg1[%c2_50, %c0_51, %c0_52] : memref<9x1x256xf32, #tpu.memory_space<vmem>>, vector<1x1x256xf32>
    %74 = vector.shape_cast %73 : vector<1x1x256xf32> to vector<1x256xf32>
    %75 = vector.broadcast %74 : vector<1x256xf32> to vector<4x256xf32>
    %76 = arith.mulf %72, %75 : vector<4x256xf32>
    %c8_53 = arith.constant 8 : index
    %c0_54 = arith.constant 0 : index
    %77 = vector.load %arg8[%c8_53, %c0_54] : memref<36x256xf32, #tpu.memory_space<vmem>>, vector<4x256xf32>
    tpu.vector_store %arg8[%c8_53, %c0_54], %76 {strides = array<i32>} : memref<36x256xf32, #tpu.memory_space<vmem>>, vector<4x256xf32>,
    %c1_i32_55 = arith.constant 1 : i32
    %78 = tpu.dynamic_rotate %59 by %c1_i32_55 dim 1 : vector<4x256xf32>, i32 -> vector<4x256xf32>
    %c3_56 = arith.constant 3 : index
    %c0_57 = arith.constant 0 : index
    %c0_58 = arith.constant 0 : index
    %79 = vector.load %arg1[%c3_56, %c0_57, %c0_58] : memref<9x1x256xf32, #tpu.memory_space<vmem>>, vector<1x1x256xf32>
    %80 = vector.shape_cast %79 : vector<1x1x256xf32> to vector<1x256xf32>
    %81 = vector.broadcast %80 : vector<1x256xf32> to vector<4x256xf32>
    %82 = arith.mulf %78, %81 : vector<4x256xf32>
    %c12_59 = arith.constant 12 : index
    %c0_60 = arith.constant 0 : index
    %83 = vector.load %arg8[%c12_59, %c0_60] : memref<36x256xf32, #tpu.memory_space<vmem>>, vector<4x256xf32>
    tpu.vector_store %arg8[%c12_59, %c0_60], %82 {strides = array<i32>} : memref<36x256xf32, #tpu.memory_space<vmem>>, vector<4x256xf32>,
    %c16_61 = arith.constant 16 : index
    %c0_62 = arith.constant 0 : index
    %84 = vector.load %arg8[%c16_61, %c0_62] : memref<36x256xf32, #tpu.memory_space<vmem>>, vector<4x256xf32>
    tpu.vector_store %arg8[%c16_61, %c0_62], %59 {strides = array<i32>} : memref<36x256xf32, #tpu.memory_space<vmem>>, vector<4x256xf32>,
    %c255_i32_63 = arith.constant 255 : i32
    %85 = tpu.dynamic_rotate %59 by %c255_i32_63 dim 1 : vector<4x256xf32>, i32 -> vector<4x256xf32>
    %c5_64 = arith.constant 5 : index
    %c0_65 = arith.constant 0 : index
    %c0_66 = arith.constant 0 : index
    %86 = vector.load %arg1[%c5_64, %c0_65, %c0_66] : memref<9x1x256xf32, #tpu.memory_space<vmem>>, vector<1x1x256xf32>
    %87 = vector.shape_cast %86 : vector<1x1x256xf32> to vector<1x256xf32>
    %88 = vector.broadcast %87 : vector<1x256xf32> to vector<4x256xf32>
    %89 = arith.mulf %85, %88 : vector<4x256xf32>
    %c20_67 = arith.constant 20 : index
    %c0_68 = arith.constant 0 : index
    %90 = vector.load %arg8[%c20_67, %c0_68] : memref<36x256xf32, #tpu.memory_space<vmem>>, vector<4x256xf32>
    tpu.vector_store %arg8[%c20_67, %c0_68], %89 {strides = array<i32>} : memref<36x256xf32, #tpu.memory_space<vmem>>, vector<4x256xf32>,
    %c241_i32_69 = arith.constant 241 : i32
    %91 = tpu.dynamic_rotate %59 by %c241_i32_69 dim 1 : vector<4x256xf32>, i32 -> vector<4x256xf32>
    %c6_70 = arith.constant 6 : index
    %c0_71 = arith.constant 0 : index
    %c0_72 = arith.constant 0 : index
    %92 = vector.load %arg1[%c6_70, %c0_71, %c0_72] : memref<9x1x256xf32, #tpu.memory_space<vmem>>, vector<1x1x256xf32>
    %93 = vector.shape_cast %92 : vector<1x1x256xf32> to vector<1x256xf32>
    %94 = vector.broadcast %93 : vector<1x256xf32> to vector<4x256xf32>
    %95 = arith.mulf %91, %94 : vector<4x256xf32>
    %c24_73 = arith.constant 24 : index
    %c0_74 = arith.constant 0 : index
    %96 = vector.load %arg8[%c24_73, %c0_74] : memref<36x256xf32, #tpu.memory_space<vmem>>, vector<4x256xf32>
    tpu.vector_store %arg8[%c24_73, %c0_74], %95 {strides = array<i32>} : memref<36x256xf32, #tpu.memory_space<vmem>>, vector<4x256xf32>,
    %c240_i32_75 = arith.constant 240 : i32
    %97 = tpu.dynamic_rotate %59 by %c240_i32_75 dim 1 : vector<4x256xf32>, i32 -> vector<4x256xf32>
    %c7_76 = arith.constant 7 : index
    %c0_77 = arith.constant 0 : index
    %c0_78 = arith.constant 0 : index
    %98 = vector.load %arg1[%c7_76, %c0_77, %c0_78] : memref<9x1x256xf32, #tpu.memory_space<vmem>>, vector<1x1x256xf32>
    %99 = vector.shape_cast %98 : vector<1x1x256xf32> to vector<1x256xf32>
    %100 = vector.broadcast %99 : vector<1x256xf32> to vector<4x256xf32>
    %101 = arith.mulf %97, %100 : vector<4x256xf32>
    %c28_79 = arith.constant 28 : index
    %c0_80 = arith.constant 0 : index
    %102 = vector.load %arg8[%c28_79, %c0_80] : memref<36x256xf32, #tpu.memory_space<vmem>>, vector<4x256xf32>
    tpu.vector_store %arg8[%c28_79, %c0_80], %101 {strides = array<i32>} : memref<36x256xf32, #tpu.memory_space<vmem>>, vector<4x256xf32>,
    %c239_i32_81 = arith.constant 239 : i32
    %103 = tpu.dynamic_rotate %59 by %c239_i32_81 dim 1 : vector<4x256xf32>, i32 -> vector<4x256xf32>
    %c8_82 = arith.constant 8 : index
    %c0_83 = arith.constant 0 : index
    %c0_84 = arith.constant 0 : index
    %104 = vector.load %arg1[%c8_82, %c0_83, %c0_84] : memref<9x1x256xf32, #tpu.memory_space<vmem>>, vector<1x1x256xf32>
    %105 = vector.shape_cast %104 : vector<1x1x256xf32> to vector<1x256xf32>
    %106 = vector.broadcast %105 : vector<1x256xf32> to vector<4x256xf32>
    %107 = arith.mulf %103, %106 : vector<4x256xf32>
    %c32_85 = arith.constant 32 : index
    %c0_86 = arith.constant 0 : index
    %108 = vector.load %arg8[%c32_85, %c0_86] : memref<36x256xf32, #tpu.memory_space<vmem>>, vector<4x256xf32>
    tpu.vector_store %arg8[%c32_85, %c0_86], %107 {strides = array<i32>} : memref<36x256xf32, #tpu.memory_space<vmem>>, vector<4x256xf32>,
    %c0_87 = arith.constant 0 : index
    %c0_88 = arith.constant 0 : index
    %109 = vector.load %arg5[%c0_87, %c0_88] : memref<4x36xf32, #tpu.memory_space<vmem>>, vector<4x36xf32>
    %c0_89 = arith.constant 0 : index
    %c0_90 = arith.constant 0 : index
    %110 = vector.load %arg8[%c0_89, %c0_90] : memref<36x256xf32, #tpu.memory_space<vmem>>, vector<36x256xf32>
    %cst_91 = arith.constant dense<0.000000e+00> : vector<4x256xf32>
    %111 = tpu.matmul %109, %110, %cst_91 {dimension_numbers = #tpu.dot_dimension_numbers<[1], [0], [0], [1], [0, 0, 1, 1], [], []>} : vector<4x36xf32>, vector<36x256xf32>, vector<4x256xf32> -> vector<4x256xf32>
    %c0_92 = arith.constant 0 : index
    %c0_93 = arith.constant 0 : index
    %112 = vector.load %arg6[%c0_92, %c0_93] : memref<4x1xf32, #tpu.memory_space<vmem>>, vector<4x1xf32>
    %113 = vector.broadcast %112 : vector<4x1xf32> to vector<4x256xf32>
    %114 = arith.addf %111, %113 : vector<4x256xf32>
    %115 = arith.addf %114, %0 : vector<4x256xf32>
    %c0_94 = arith.constant 0 : index
    %c0_95 = arith.constant 0 : index
    %116 = vector.load %arg7[%c0_94, %c0_95] : memref<4x256xf32, #tpu.memory_space<vmem>>, vector<4x256xf32>
    tpu.vector_store %arg7[%c0_94, %c0_95], %115 {strides = array<i32>} : memref<4x256xf32, #tpu.memory_space<vmem>>, vector<4x256xf32>,
    return
  }
  func.func @transform_0(%arg0: i32) -> (i32, i32, i32) {
    %c0_i32 = arith.constant 0 : i32
    %c0_i32_0 = arith.constant 0 : i32
    %c0_i32_1 = arith.constant 0 : i32
    %c0_i32_2 = arith.constant 0 : i32
    return %c0_i32, %c0_i32_0, %c0_i32_1 : i32, i32, i32
  }
  func.func @transform_1(%arg0: i32) -> (i32, i32) {
    %c0_i32 = arith.constant 0 : i32
    %c0_i32_0 = arith.constant 0 : i32
    return %c0_i32, %arg0 : i32, i32
  }
  func.func @transform_2(%arg0: i32) -> (i32, i32) {
    %c0_i32 = arith.constant 0 : i32
    %c0_i32_0 = arith.constant 0 : i32
    %c0_i32_1 = arith.constant 0 : i32
    return %c0_i32, %c0_i32_0 : i32, i32
  }
  func.func @transform_3(%arg0: i32) -> (i32, i32) {
    %c0_i32 = arith.constant 0 : i32
    %c0_i32_0 = arith.constant 0 : i32
    %c0_i32_1 = arith.constant 0 : i32
    return %c0_i32, %c0_i32_0 : i32, i32
  }
  func.func @transform_4(%arg0: i32) -> (i32, i32) {
    %c0_i32 = arith.constant 0 : i32
    %c0_i32_0 = arith.constant 0 : i32
    %c0_i32_1 = arith.constant 0 : i32
    return %c0_i32, %c0_i32_0 : i32, i32
  }
  func.func @transform_5(%arg0: i32) -> (i32, i32) {
    %c0_i32 = arith.constant 0 : i32
    %c0_i32_0 = arith.constant 0 : i32
    %c0_i32_1 = arith.constant 0 : i32
    return %c0_i32, %c0_i32_0 : i32, i32
  }
  func.func @transform_6(%arg0: i32) -> (i32, i32) {
    %c0_i32 = arith.constant 0 : i32
    %c0_i32_0 = arith.constant 0 : i32
    return %c0_i32, %arg0 : i32, i32
  }
}

</mosaic_0001>

<bundles_post_ra>
// kernel: tpu_custom_call.1
= control target key start
LH: loop header
LB: loop body
LE: loop exit
PB: predicated region body
PF: predicated region fallthrough
CT: control target
= control target key end

     0   :  { %11 = vsyncpa [#allocation4], 0  ;;  %s1457_s0 = inlined_call_operand.hbm [shape: f32[9,1,256], index: 0, kind: input, shape index: {}]   ;;  %s1458_s1 = inlined_call_operand.hbm [shape: f32[4,512], index: 1, kind: input, shape index: {}]   ;;  %s1459_s2 = inlined_call_operand.vmem [shape: f32[4,36], index: 2, kind: input, shape index: {}]   ;;  %s1460_s3 = inlined_call_operand.vmem [shape: f32[4,1], index: 3, kind: input, shape index: {}]   ;;  %s1461_s4 = inlined_call_operand.vmem [shape: f32[4,36], index: 4, kind: input, shape index: {}]   ;;  %s1462_s5 = inlined_call_operand.vmem [shape: f32[4,1], index: 5, kind: input, shape index: {}]   ;;  %s1463_s6 = inlined_call_operand.hbm [shape: f32[4,512], index: 6, kind: output, shape index: {}]  }
   0x1   :  { %12 = vsyncpa [#allocation7], 0 }
   0x2   :  { %14 = vsyncpa [#allocation7 + $0x1], 0 }
   0x3   :  { %15 = vsyncpa [#allocation5], 0 }
   0x4   :  { %17 = vsyncpa [#allocation5 + $0x1], 0  ;;  %s1186_s21 = smov 0   ;;  %s1188_s22 = smov 0  }
   0x5   :  { %s1190_s23 = smov 0   ;;  %s1192_s24 = smov 0  }
   0x6 LB: > { %s196_s27 = sshll.u32 %s1457_s0, 4  ;;  %s1210_s28 = sadd.s32 4294967295, %s1137_s24   ;;  %s1137_s24 = sphi %s1192_s24, %s1473_s24   ;;  %s1133_s23 = sphi %s1190_s23, %s1472_s23   ;;  %s1129_s22 = sphi %s1188_s22, %s1471_s22   ;;  %s1125_s21 = sphi %s1186_s21, %s1470_s21   ;;  %s197_s27 = int_to_ptr.hbm [resolvable:$true] %s196_s27 }
   0x7   : > { %p912_p0 = scmp.ge.s32.totalorder %s1137_s24, 1  ;;  %p65_p1 = scmp.eq.s32.totalorder %s1210_s28, 0 }
   0x8   : > { %p185_p2 = scmp.lt.s32.totalorder %s1137_s24, 3  ;;  %s1139_s30 = smov [#allocation3]  }
   0x9   : > { %s198_s7 = sshll.u32 %s1139_s30, 4  ;;  %s1140_s8 = smov 32   ;;  %s199_s7 = int_to_ptr.vmem [resolvable:$true] %s198_s7 }
   0xa   : > { %p1215_p3 = pnand %p912_p0, %p185_p2  ;;  %s1141_s9 = smov 2  }
   0xb   : > { %s911_s10 = sadd.s32 4294967294, %s1137_s24   ;;  %s1226_s11 = sadd.s32 1, %s1137_s24  }
   0xc   : > { %p945_p4 = pneg %p1215_p3  ;;  %s51_s12 = sadd.s32 1, %s1133_s23 }
   0xd   : > { %s48_s13 = ssub.s32 %s1137_s24, %s1226_s11  ;;  %p58_p7 = scmp.ne.s32.totalorder %s1133_s23, %s1129_s22 }
   0xe   : > { %p946_p6 = pnand %p945_p4, %p65_p1  ;;  %p49_p8 = scmp.eq.s32.totalorder %s48_s13, 0 }
   0xf   : > { %p59_p9 = scmp.eq.s32.totalorder %s1137_s24, 0  ;;  %p64_p10 = scmp.ne.s32.totalorder %s1129_s22, %s1125_s21 }
  0x10   : > { %948 = dma.hbm_to_vmem [thread:$0]  (!%p946_p6), %s197_s27, 288, %s199_s7, [#allocation4], %s1140_s8, %s1140_s8, %s1141_s9  }
  0x11   : > { %p172_p11 = scmp.eq.s32.totalorder %s1210_s28, 1  ;;  %p1242_p12 = por %p65_p1, %p64_p10 }
  0x12   : > { %s1238_s14 = scalar_select %p49_p8, %s1133_s23, %s51_s12  }
  0x13   : > { %p1246_p13 = por %p172_p11, %p58_p7  ;;  %p178_p0 = scmp.eq.s32.totalorder %s911_s10, 1 }
  0x14   : > { %p60_p2 = por %p59_p9, %p58_p7  ;;  %s224_s17 = sand.u32 1, %s1133_s23  }
  0x15   : > { %p1251_p4 = por %p178_p0, %p64_p10  ;;  %p958_p6 = scmp.lt.s32.totalorder %s1137_s24, 2 }
  0x16   : > { %s915_s19 = sshll.u32 %s224_s17, 3  ;;  %s935_s20 = sshll.u32 %s1137_s24, 3 }
  0x17   : > { %s233_s27 = scalar_lea.hbm %s1458_s1, %s935_s20  ;;  %s228_s7 = scalar_lea.vmem [#allocation6], %s915_s19 }
  0x18   : > { %s235_s30 = sshll.u32 %s233_s27, 4  ;;  %s237_s8 = sshll.u32 %s228_s7, 4  ;;  %s236_s30 = int_to_ptr.hbm [resolvable:$true] %s235_s30  ;;  %s238_s8 = int_to_ptr.vmem [resolvable:$true] %s237_s8 }
  0x19   : > { %p1260_p8 = pnand %p958_p6, %p60_p2  ;;  %s225_s10 = scalar_lea.sflag [#allocation7], %s224_s17 }
  0x1a   : > { %s1037_s12 = sshra.s32 %s236_s30, 4  ;;  %s1044_s19 = scalar_lea.hbm %s1458_s1, 16  ;;  %s1038_s12 = int_to_ptr.hbm [resolvable:$true] %s1037_s12 }
  0x1b   : > { %s1039_s13 = scalar_lea.hbm %s1038_s12, 8  ;;  %p1041_p9 = pneg %p1260_p8 }
  0x1c   : > { %p1040_p7 = scmp.ne.s32.totalorder %s1038_s12, %s1039_s13  ;;  %p1045_p0 = scmp.lt.s32.totalorder %s1038_s12, %s1458_s1 }
  0x1d   : > { %p1046_p2 = scmp.lt.s32.totalorder %s1044_s19, %s1039_s13 }
  0x1e   : > { %p1042_p10 = pnand %p1041_p9, %p1040_p7 }
  0x1f   : > { %p1047_p6 = por %p1046_p2, %p1045_p0 }
  0x20   : > { %p1043_p11 = pneg %p1042_p10 }
  0x22   : > { %p1048_p5 = pnand %p1047_p6, %p1043_p11 }
  0x24   : > { %1051 = shalt.err (!%p1048_p5)
}
  0x25   : > { %952 = dma.hbm_to_vmem [thread:$0]  (!%p1260_p8), %s236_s30, 128, %s238_s8, %s225_s10  }
  0x26   : > { %246 = sbr.rel (%p1215_p3) target bundleno = 703 (0x2bf), region = 44 }
  0x2b   : > { %1112 = dma.done.wait (%p65_p1), [#allocation4], 288  }
  0x2c   : > { %1114 = vsyncadd (%p65_p1), [#allocation4], 4294967008  ;;  %s1281_s17 = sand.u32 1, %s1129_s22  }
  0x2d   : > { %s920_s7 = sshll.u32 %s1281_s17, 3  ;;  %s254_s12 = scalar_lea.sflag [#allocation7], %s1281_s17 }
  0x2e   : > { %s257_s30 = scalar_lea.vmem [#allocation6], %s920_s7 }
  0x2f   : > { %1116 = dma.done.wait (%p1242_p12), %s254_s12, 128  }
  0x30   : > { %1118 = vsyncadd (%p1242_p12), %s254_s12, 4294967168  ;;  %v289_v0 = vld [vmem:[%s257_s30] sm:$0xff]  ;;  %s1142_s29 = smov 16   ;;  %s1143_s8 = smov 15   ;;  %v301_v21 = vlaneseq  ;;  %v329_v23 = vld [vmem:[#allocation3 + $0x2] sm:$0x3] }
  0x31   : > { %v290_v1 = vmax.f32 %v289_v0, 0.0  ;;  %s1144_s15 = smov 1   ;;  %s1145_s9 = smov 127   ;;  %v331_v24 = vperm.slane %v329_v23, 0  ;;  %v332_v25 = vperm.slane %v329_v23, 1  ;;  %vm529_vm8 = vcmask 1043456  }
  0x32   : > { %s1146_s10 = smov 113   ;;  %s1147_s13 = smov 112   ;;  %v1307_v22 = vand.u32 127, %v301_v21  ;;  %v381_v36 = vld [vmem:[#allocation3 + $0x6] sm:$0x3]  ;;  %vm525_vm9 = vcmask 293888  }
  0x33   : > { %292 = vst [vmem:[#allocation1] ss:$2 sm:$0xff] %v290_v1  ;;  %s1148_s20 = smov 17   ;;  %s1149_s25 = smov 111   ;;  %v383_v37 = vperm.slane %v381_v36, 0  ;;  %v384_v38 = vperm.slane %v381_v36, 1 }
  0x34   : > { %vm325_vm0 = vcmp.lt.s32.totalorder %v1307_v22, 16  ;;  %vm377_vm1 = vcmp.lt.s32.totalorder %v1307_v22, 1  ;;  %vm413_vm2 = vcmp.lt.s32.totalorder %v1307_v22, 127  ;;  %v417_v40 = vld [vmem:[#allocation3 + $0xa] sm:$0x3]  ;;  %vm442_vm3 = vcmp.lt.s32.totalorder %v1307_v22, 113 }
  0x35   : > { %v419_v43 = vperm.slane %v417_v40, 0  ;;  %v420_v44 = vperm.slane %v417_v40, 1  ;;  %v446_v56 = vld [vmem:[#allocation3 + $0xc] sm:$0x3]  ;;  %vm465_vm4 = vcmp.lt.s32.totalorder %v1307_v22, 112  ;;  %vm303_vm5 = vcmp.lt.s32.totalorder %v1307_v22, 17 }
  0x36   : > { %v448_v57 = vperm.slane %v446_v56, 0  ;;  %v449_v58 = vperm.slane %v446_v56, 1  ;;  %vm494_vm6 = vcmp.lt.s32.totalorder %v1307_v22, 111  ;;  %vm354_vm7 = vcmp.lt.s32.totalorder %v1307_v22, 15 }
  0x3a   : > { %v293_v2 = vld.sshfl [vmem:[#allocation1] sm:$0xff pattern:$0x75316420]  ;;  %v294_v3 = vld.sshfl [vmem:[#allocation1 + $0x8] sm:$0xff pattern:$0x75316420] }
  0x3b   : > { %316 = vst [vmem:[#allocation1] ss:$2 sm:$0xff] %v290_v1 }
  0x42   : > { %v317_v4 = vld.sshfl [vmem:[#allocation1] sm:$0xff pattern:$0x75316420]  ;;  %v318_v5 = vld.sshfl [vmem:[#allocation1 + $0x8] sm:$0xff pattern:$0x75316420] }
  0x43   : > { %345 = vst [vmem:[#allocation1] ss:$2 sm:$0xff] %v290_v1  ;;  %321 = vrot.lane.b32.xlu1 %v317_v4, %s1142_s29  ;;  %323 = vrot.lane.b32.xlu2 %v318_v5, %s1142_s29 }
  0x4a   : > { %v346_v6 = vld.sshfl [vmem:[#allocation1] sm:$0xff pattern:$0x75316420]  ;;  %v347_v7 = vld.sshfl [vmem:[#allocation1 + $0x8] sm:$0xff pattern:$0x75316420] }
  0x4b   : > { %350 = vrot.lane.b32.xlu0 %v346_v6, %s1143_s8  ;;  %368 = vst [vmem:[#allocation1] ss:$2 sm:$0xff] %v290_v1 }
  0x52   : > { %v369_v8 = vld.sshfl [vmem:[#allocation1] sm:$0xff pattern:$0x75316420]  ;;  %v370_v9 = vld.sshfl [vmem:[#allocation1 + $0x8] sm:$0xff pattern:$0x75316420] }
  0x53   : > { %375 = vrot.lane.b32.xlu0 %v370_v9, %s1144_s15  ;;  %397 = vst [vmem:[#allocation1] ss:$2 sm:$0xff] %v290_v1  ;;  %373 = vrot.lane.b32.xlu2 %v369_v8, %s1144_s15 }
  0x5a   : > { %v398_v10 = vld.sshfl [vmem:[#allocation1] sm:$0xff pattern:$0x75316420]  ;;  %v399_v11 = vld.sshfl [vmem:[#allocation1 + $0x8] sm:$0xff pattern:$0x75316420] }
  0x5b   : > { %404 = vst [vmem:[#allocation1] ss:$2 sm:$0xff] %v290_v1 }
  0x5c   : > { %402 = vst [vmem:[#allocation2 + $0x48] sm:$0xf] %v398_v10  ;;  %v1150_v10 = vmov 0  }
  0x5d   : > { %403 = vst [vmem:[#allocation2 + $0x28] sm:$0xf] %v399_v11  ;;  %1005 = vset.pattern.permute.xlu1 %v1150_v10  ;;  %1006 = vset.pattern.permute.xlu0 %v1150_v10 }
  0x62   : > { %v405_v12 = vld.sshfl [vmem:[#allocation1] sm:$0xff pattern:$0x75316420]  ;;  %v406_v13 = vld.sshfl [vmem:[#allocation1 + $0x8] sm:$0xff pattern:$0x75316420] }
  0x63   : > { %433 = vst [vmem:[#allocation1] ss:$2 sm:$0xff] %v290_v1  ;;  %409 = vrot.lane.b32.xlu2 %v405_v12, %s1145_s9 }
  0x6a   : > { %v434_v14 = vld.sshfl [vmem:[#allocation1] sm:$0xff pattern:$0x75316420]  ;;  %v435_v15 = vld.sshfl [vmem:[#allocation1 + $0x8] sm:$0xff pattern:$0x75316420] }
  0x6b   : > { %438 = vrot.lane.b32.xlu0 %v434_v14, %s1146_s10  ;;  %440 = vrot.lane.b32.xlu1 %v435_v15, %s1146_s10  ;;  %456 = vst [vmem:[#allocation1] ss:$2 sm:$0xff] %v290_v1  ;;  %v498_v14 = vld [vmem:[#allocation3 + $0x10] sm:$0x3] }
  0x6c   : > { %411 = vrot.lane.b32.xlu2 %v406_v13, %s1145_s9  ;;  %v306_v13 = vld [vmem:[#allocation3] sm:$0x3]  ;;  %v501_v21 = vperm.slane %v498_v14, 1 }
  0x72   : > { %v457_v16 = vld.sshfl [vmem:[#allocation1] sm:$0xff pattern:$0x75316420]  ;;  %v458_v17 = vld.sshfl [vmem:[#allocation1 + $0x8] sm:$0xff pattern:$0x75316420] }
  0x73   : > { %461 = vrot.lane.b32.xlu0 %v457_v16, %s1147_s13  ;;  %485 = vst [vmem:[#allocation1] ss:$2 sm:$0xff] %v290_v1 }
  0x74   : > { %297 = vrot.lane.b32.xlu2 %v293_v2, %s1148_s20  ;;  %v469_v2 = vld [vmem:[#allocation3 + $0xe] sm:$0x3] }
  0x75   : > { %v472_v4 = vperm.slane %v469_v2, 1 }
  0x7a   : > { %v486_v18 = vld.sshfl [vmem:[#allocation1] sm:$0xff pattern:$0x75316420]  ;;  %v487_v19 = vld.sshfl [vmem:[#allocation1 + $0x8] sm:$0xff pattern:$0x75316420] }
  0x7b   : > { %463 = vrot.lane.b32.xlu0 %v458_v17, %s1147_s13  ;;  %490 = vrot.lane.b32.xlu1 %v486_v18, %s1149_s25  ;;  %799 = vst [vmem:[#allocation1] ss:$2 sm:$0xff] %v289_v0  ;;  %v308_v18 = vperm.slane %v306_v13, 0 }
  0x83   : > { %299 = vrot.lane.b32.xlu0 %v294_v3, %s1148_s20  ;;  %492 = vrot.lane.b32.xlu1 %v487_v19, %s1149_s25  ;;  %v471_v3 = vperm.slane %v469_v2, 0  ;;  %v309_v19 = vperm.slane %v306_v13, 1 }
  0x8b   : > { %352 = vrot.lane.b32.xlu1 %v347_v7, %s1143_s8  ;;  %v519_v7 = vld [vmem:[%s1460_s3] sm:$0xf] }
  0x93   : > { %522 = vperm.xlu1 %1005, %v519_v7  }
  0x9d   : > { %v324_v20 = vpop.permute.xlu2 %323 }
  0xad   : > { %v374_v26 = vpop.permute.xlu2 %373 }
  0xb5   : > { %v322_v27 = vpop.permute.xlu1 %321 }
  0xb6   : > { %v326_v28 = vsel %vm325_vm0, %v322_v27, %v324_v20  ;;  %v327_v29 = vsel %vm325_vm0, %v324_v20, %v322_v27  ;;  %v500_v20 = vperm.slane %v498_v14, 0  ;;  %v662_v14 = vld [vmem:[#allocation3 + $0xa] sm:$0x3] }
  0xb7   : > { %v335_v30 = vmul.f32 %v331_v24, %v327_v29  ;;  %v336_v31 = vmul.f32 %v332_v25, %v326_v28 }
  0xb9   : > { %v339_v32 = vrot.slane %v335_v30, 4  ;;  %v340_v33 = vrot.slane %v336_v31, 4 }
  0xbb   : > { %343 = vst [vmem:[#allocation2 + $0x30] sm:$0xf0] %v339_v32 }
  0xbc   : > { %344 = vst [vmem:[#allocation2] sm:$0xf0] %v340_v33  ;;  %v358_v33 = vld [vmem:[#allocation3 + $0x4] sm:$0x3] }
  0xbd   : > { %v1314_v34 = vpop.permute.xlu0 %350  ;;  %v410_v35 = vpop.permute.xlu2 %409  ;;  %v361_v36 = vperm.slane %v358_v33, 1 }
  0xc5   : > { %v376_v39 = vpop.permute.xlu0 %375 }
  0xc6   : > { %v378_v41 = vsel %vm377_vm1, %v374_v26, %v376_v39  ;;  %v379_v42 = vsel %vm377_vm1, %v376_v39, %v374_v26  ;;  %v412_v45 = vpop.permute.xlu2 %411 }
  0xc7   : > { %v387_v46 = vmul.f32 %v383_v37, %v379_v42  ;;  %v388_v47 = vmul.f32 %v384_v38, %v378_v41  ;;  %v414_v48 = vsel %vm413_vm2, %v410_v35, %v412_v45  ;;  %v415_v49 = vsel %vm413_vm2, %v412_v45, %v410_v35 }
  0xc8   : > { %v423_v50 = vmul.f32 %v419_v43, %v414_v48  ;;  %v424_v51 = vmul.f32 %v420_v44, %v415_v49  ;;  %v360_v35 = vperm.slane %v358_v33, 0  ;;  %v508_v49 = vld [vmem:[%s1459_s2] sm:$0xf] }
  0xc9   : > { %v391_v52 = vrot.slane %v387_v46, 4  ;;  %v392_v53 = vrot.slane %v388_v47, 4 }
  0xca   : > { %v427_v54 = vrot.slane %v423_v50, 4  ;;  %v428_v55 = vrot.slane %v424_v51, 4 }
  0xcb   : > { %395 = vst [vmem:[#allocation2 + $0x18] sm:$0xf0] %v391_v52 }
  0xcc   : > { %396 = vst [vmem:[#allocation2 + $0x10] sm:$0xf0] %v392_v53 }
  0xcd   : > { %431 = vst [vmem:[#allocation2 + $0x48] sm:$0xf0] %v427_v54 }
  0xce   : > { %432 = vst [vmem:[#allocation2 + $0x28] sm:$0xf0] %v428_v55  ;;  %v298_v17 = vpop.permute.xlu2 %297 }
  0xd4   : > { %v513_v46 = vld [vmem:[#allocation2 + $0x48] sm:$0xff] }
  0xd5   : > { %v514_v47 = vld [vmem:[#allocation2 + $0x28] sm:$0xff] }
  0xdd   : > { %v439_v59 = vpop.permute.xlu0 %438  ;;  %v441_v60 = vpop.permute.xlu1 %440 }
  0xde   : > { %v443_v61 = vsel %vm442_vm3, %v439_v59, %v441_v60  ;;  %v444_v62 = vsel %vm442_vm3, %v441_v60, %v439_v59 }
  0xdf   : > { %v452_v63 = vmul.f32 %v448_v57, %v443_v61  ;;  %v453_v0 = vmul.f32 %v449_v58, %v444_v62  ;;  %v722_v61 = vld [vmem:[#allocation3 + $0x10] sm:$0x3]  ;;  %v700_v62 = vld [vmem:[#allocation3 + $0xe] sm:$0x3] }
  0xe0   : > { %v703_v2 = vperm.slane %v700_v62, 1 }
  0xe1   : > { %454 = vst [vmem:[#allocation2 + $0x8] sm:$0xf] %v452_v63  ;;  %v724_v63 = vperm.slane %v722_v61, 0 }
  0xe2   : > { %455 = vst [vmem:[#allocation2 + $0x20] sm:$0xf] %v453_v0  ;;  %v725_v0 = vperm.slane %v722_v61, 1 }
  0xe5   : > { %v462_v1 = vpop.permute.xlu0 %461 }
  0xed   : > { %v464_v5 = vpop.permute.xlu0 %463  ;;  %v491_v6 = vpop.permute.xlu1 %490 }
  0xee   : > { %v466_v8 = vsel %vm465_vm4, %v462_v1, %v464_v5  ;;  %v467_v9 = vsel %vm465_vm4, %v464_v5, %v462_v1  ;;  %v702_v1 = vperm.slane %v700_v62, 0  ;;  %v622_v62 = vld [vmem:[#allocation3 + $0x4] sm:$0x3] }
  0xef   : > { %v475_v11 = vmul.f32 %v471_v3, %v466_v8  ;;  %v476_v12 = vmul.f32 %v472_v4, %v467_v9 }
  0xf1   : > { %v479_v15 = vrot.slane %v475_v11, 4  ;;  %v480_v16 = vrot.slane %v476_v12, 4 }
  0xf3   : > { %483 = vst [vmem:[#allocation2 + $0x8] sm:$0xf0] %v479_v15 }
  0xf4   : > { %484 = vst [vmem:[#allocation2 + $0x20] sm:$0xf0] %v480_v16 }
  0xf5   : > { %v300_v23 = vpop.permute.xlu0 %299  ;;  %v493_v24 = vpop.permute.xlu1 %492 }
  0xf6   : > { %v304_v25 = vsel %vm303_vm5, %v298_v17, %v300_v23  ;;  %v305_v26 = vsel %vm303_vm5, %v300_v23, %v298_v17  ;;  %v495_v27 = vsel %vm494_vm6, %v491_v6, %v493_v24  ;;  %v496_v28 = vsel %vm494_vm6, %v493_v24, %v491_v6 }
  0xf7   : > { %v312_v29 = vmul.f32 %v308_v18, %v305_v26  ;;  %v313_v30 = vmul.f32 %v309_v19, %v304_v25  ;;  %v504_v31 = vmul.f32 %v500_v20, %v495_v27  ;;  %v505_v32 = vmul.f32 %v501_v21, %v496_v28  ;;  %v638_v27 = vld [vmem:[#allocation3 + $0x6] sm:$0x3] }
  0xf8   : > { %v664_v17 = vperm.slane %v662_v14, 0  ;;  %v665_v18 = vperm.slane %v662_v14, 1  ;;  %v640_v33 = vperm.slane %v638_v27, 0 }
  0xf9   : > { %314 = vst [vmem:[#allocation2 + $0x30] sm:$0xf] %v312_v29 }
  0xfa   : > { %315 = vst [vmem:[#allocation2] sm:$0xf] %v313_v30  ;;  %v515_v44 = vld [vmem:[#allocation2 + $0x8] sm:$0xff]  ;;  %v684_v30 = vld [vmem:[#allocation3 + $0xc] sm:$0x3] }
  0xfb   : > { %506 = vst [vmem:[#allocation2 + $0x40] sm:$0xf] %v504_v31  ;;  %v516_v45 = vld [vmem:[#allocation2 + $0x20] sm:$0xff] }
  0xfc   : > { %507 = vst [vmem:[#allocation2 + $0x38] sm:$0xf] %v505_v32 }
  0xfd   : > { %v353_v37 = vpop.permute.xlu1 %352 }
  0xfe   : > { %v355_v38 = vsel %vm354_vm7, %v1314_v34, %v353_v37  ;;  %v356_v39 = vsel %vm354_vm7, %v353_v37, %v1314_v34  ;;  %v687_v37 = vperm.slane %v684_v30, 1 }
  0xff   : > { %v364_v40 = vmul.f32 %v360_v35, %v356_v39  ;;  %v365_v41 = vmul.f32 %v361_v36, %v355_v38  ;;  %v641_v35 = vperm.slane %v638_v27, 1  ;;  %v686_v36 = vperm.slane %v684_v30, 0  ;;  %v801_v27 = vld.sshfl [vmem:[#allocation1 + $0x8] sm:$0xff pattern:$0x75316420] }
 0x100   : > { %v509_v50 = vld [vmem:[#allocation2 + $0x30] sm:$0xff]  ;;  %v800_v30 = vld.sshfl [vmem:[#allocation1] sm:$0xff pattern:$0x75316420] }
 0x101   : > { %366 = vst [vmem:[#allocation2 + $0x18] sm:$0xf] %v364_v40  ;;  %v510_v51 = vld [vmem:[#allocation2] sm:$0xff] }
 0x102   : > { %367 = vst [vmem:[#allocation2 + $0x10] sm:$0xf] %v365_v41  ;;  %v517_v42 = vld [vmem:[#allocation2 + $0x40] sm:$0xf] }
 0x103   : > { %922 = vmatpush.msk.msra.mxu0 %vm529_vm8, %v517_v42  ;;  %v518_v43 = vld [vmem:[#allocation2 + $0x38] sm:$0xf] }
 0x104   : > { %924 = vmatpush.msk.msra.mxu1 %vm529_vm8, %v518_v43  ;;  %v743_v42 = vld [vmem:[%s1462_s5] sm:$0xf] }
 0x105   : > { %548 = vmatpush.msra.mxu0 %v515_v44  ;;  %v523_v52 = vpop.permute.xlu1 %522 }
 0x106   : > { %568 = vmatpush.msra.mxu1 %v516_v45 }
 0x107   : > { %549 = vmatpush.msra.mxu0 %v513_v46 }
 0x108   : > { %569 = vmatpush.msra.mxu1 %v514_v47  ;;  %v511_v34 = vld [vmem:[#allocation2 + $0x18] sm:$0xff] }
 0x109   : > { %550 = vmatpush.msra.mxu0 %v511_v34  ;;  %v512_v48 = vld [vmem:[#allocation2 + $0x10] sm:$0xff] }
 0x10a   : > { %570 = vmatpush.msra.mxu1 %v512_v48 }
 0x10b   : > { %551 = vmatpush.msra.mxu0 %v509_v50  ;;  %v600_v50 = vld [vmem:[#allocation3 + $0x2] sm:$0x3] }
 0x10c   : > { %571 = vmatpush.msra.mxu1 %v510_v51  ;;  %923 = vmatmul.msk.f32.vlgmr.msra.gmra.mxu0 %vm525_vm9, %v508_v49 }
 0x10d   : > { %925 = vmatmul.msk.f32.vlgmr.msra.gmra.mxu1 %vm525_vm9, %v508_v49 }
 0x189   : > { %v553_v53 = vpop.f32.mrf.mxu0 }
 0x18a   : > { %v573_v54 = vpop.f32.mrf.mxu1  ;;  %v554_v55 = vadd.f32 %v553_v53, %v523_v52  ;;  %v603_v53 = vperm.slane %v600_v50, 1 }
 0x18b   : > { %v574_v56 = vadd.f32 %v573_v54, %v523_v52  ;;  %v602_v52 = vperm.slane %v600_v50, 0 }
 0x18c   : > { %v576_v57 = vmax.f32 %v554_v55, 0.0 }
 0x18d   : > { %v577_v58 = vmax.f32 %v574_v56, 0.0 }
 0x18e   : > { %654 = vst [vmem:[#allocation2 + $0x48] sm:$0xf] %v576_v57  ;;  %716 = vrot.lane.b32.xlu1 %v576_v57, %s1149_s25  ;;  %694 = vrot.lane.b32.xlu2 %v576_v57, %s1147_s13 }
 0x18f   : > { %655 = vst [vmem:[#allocation2 + $0x28] sm:$0xf] %v577_v58  ;;  %696 = vrot.lane.b32.xlu0 %v577_v58, %s1147_s13 }
 0x196   : > { %658 = vrot.lane.b32.xlu1 %v577_v58, %s1145_s9  ;;  %718 = vrot.lane.b32.xlu2 %v577_v58, %s1149_s25  ;;  %s286_s25 = scalar_lea.vmem [#allocation8], %s920_s7  ;;  %s1087_s7 = scalar_lea.hbm %s1463_s6, 16 }
 0x197   : > { %656 = vrot.lane.b32.xlu0 %v576_v57, %s1145_s9  ;;  %s936_s9 = sshll.u32 %s1210_s28, 3  ;;  %s826_s19 = sshll.u32 %s286_s25, 4  ;;  %s827_s19 = int_to_ptr.vmem [resolvable:$true] %s826_s19 }
 0x198   : > { %s813_s28 = scalar_lea.sflag [#allocation5], %s1281_s17 }
 0x19e   : > { %632 = vrot.lane.b32.xlu1 %v576_v57, %s1144_s15  ;;  %678 = vrot.lane.b32.xlu2 %v576_v57, %s1146_s10 }
 0x19f   : > { %680 = vrot.lane.b32.xlu0 %v577_v58, %s1146_s10 }
 0x1a6   : > { %596 = vrot.lane.b32.xlu1 %v577_v58, %s1142_s29  ;;  %634 = vrot.lane.b32.xlu2 %v577_v58, %s1144_s15 }
 0x1a7   : > { %594 = vrot.lane.b32.xlu0 %v576_v57, %s1142_s29 }
 0x1ae   : > { %578 = vrot.lane.b32.xlu1 %v576_v57, %s1148_s20  ;;  %616 = vrot.lane.b32.xlu2 %v576_v57, %s1143_s8 }
 0x1af   : > { %618 = vrot.lane.b32.xlu0 %v577_v58, %s1143_s8 }
 0x1b6   : > { %580 = vrot.lane.b32.xlu2 %v577_v58, %s1148_s20  ;;  %s824_s20 = scalar_lea.hbm %s1463_s6, %s936_s9 }
 0x1b7   : > { %746 = vperm.xlu0 %1006, %v743_v42   ;;  %s828_s26 = sshll.u32 %s824_s20, 4  ;;  %s829_s26 = int_to_ptr.hbm [resolvable:$true] %s828_s26 }
 0x1b8   : > { %s1081_s27 = sshra.s32 %s829_s26, 4  ;;  %s1082_s27 = int_to_ptr.hbm [resolvable:$true] %s1081_s27 }
 0x1b9   : > { %s1083_s12 = scalar_lea.hbm %s1082_s27, 8  ;;  %p1088_p12 = scmp.lt.s32.totalorder %s1082_s27, %s1463_s6 }
 0x1ba   : > { %p1084_p1 = scmp.ne.s32.totalorder %s1082_s27, %s1083_s12  ;;  %p1089_p8 = scmp.lt.s32.totalorder %s1087_s7, %s1083_s12 }
 0x1bc   : > { %p1085_p3 = pnand %p1084_p1, %p1246_p13  ;;  %p1090_p7 = por %p1089_p8, %p1088_p12 }
 0x1be   : > { %p1086_p5 = pneg %p1085_p3 }
 0x1c0   : > { %p1091_p9 = pnand %p1090_p7, %p1086_p5 }
 0x1e8   : > { %v695_v59 = vpop.permute.xlu2 %694 }
 0x1f0   : > { %v719_v60 = vpop.permute.xlu2 %718 }
 0x1f8   : > { %v679_v7 = vpop.permute.xlu2 %678 }
 0x200   : > { %v717_v3 = vpop.permute.xlu1 %716  ;;  %v635_v28 = vpop.permute.xlu2 %634 }
 0x201   : > { %v697_v4 = vpop.permute.xlu0 %696  ;;  %v720_v5 = vsel %vm494_vm6, %v717_v3, %v719_v60  ;;  %v721_v6 = vsel %vm494_vm6, %v719_v60, %v717_v3  ;;  %v584_v60 = vld [vmem:[#allocation3] sm:$0x3] }
 0x202   : > { %v698_v8 = vsel %vm465_vm4, %v695_v59, %v697_v4  ;;  %v699_v9 = vsel %vm465_vm4, %v697_v4, %v695_v59  ;;  %v728_v10 = vmul.f32 %v724_v63, %v720_v5  ;;  %v729_v11 = vmul.f32 %v725_v0, %v721_v6 }
 0x203   : > { %v706_v12 = vmul.f32 %v702_v1, %v698_v8  ;;  %v707_v13 = vmul.f32 %v703_v2, %v699_v9  ;;  %v586_v3 = vperm.slane %v584_v60, 0  ;;  %v624_v5 = vperm.slane %v622_v62, 0 }
 0x204   : > { %730 = vst [vmem:[#allocation2 + $0x40] sm:$0xf] %v728_v10  ;;  %v625_v6 = vperm.slane %v622_v62, 1 }
 0x205   : > { %v710_v15 = vrot.slane %v706_v12, 4  ;;  %v711_v16 = vrot.slane %v707_v13, 4  ;;  %731 = vst [vmem:[#allocation2 + $0x38] sm:$0xf] %v729_v11 }
 0x207   : > { %714 = vst [vmem:[#allocation2 + $0x8] sm:$0xf0] %v710_v15 }
 0x208   : > { %715 = vst [vmem:[#allocation2 + $0x20] sm:$0xf0] %v711_v16  ;;  %v659_v19 = vpop.permute.xlu1 %658  ;;  %v617_v51 = vpop.permute.xlu2 %616 }
 0x209   : > { %v657_v20 = vpop.permute.xlu0 %656 }
 0x20a   : > { %v660_v21 = vsel %vm413_vm2, %v657_v20, %v659_v19  ;;  %v661_v23 = vsel %vm413_vm2, %v659_v19, %v657_v20 }
 0x20b   : > { %v668_v24 = vmul.f32 %v664_v17, %v660_v21  ;;  %v669_v25 = vmul.f32 %v665_v18, %v661_v23  ;;  %v741_v26 = vld [vmem:[#allocation2 + $0x40] sm:$0xf]  ;;  %v732_v21 = vld [vmem:[%s1461_s4] sm:$0xf] }
 0x20c   : > { %926 = vmatpush.msk.msra.mxu2 %vm529_vm8, %v741_v26  ;;  %v742_v29 = vld [vmem:[#allocation2 + $0x38] sm:$0xf] }
 0x20d   : > { %v672_v31 = vrot.slane %v668_v24, 4  ;;  %v673_v32 = vrot.slane %v669_v25, 4  ;;  %928 = vmatpush.msk.msra.mxu3 %vm529_vm8, %v742_v29 }
 0x20f   : > { %676 = vst [vmem:[#allocation2 + $0x48] sm:$0xf0] %v672_v31 }
 0x210   : > { %677 = vst [vmem:[#allocation2 + $0x28] sm:$0xf0] %v673_v32  ;;  %v633_v38 = vpop.permute.xlu1 %632  ;;  %v581_v8 = vpop.permute.xlu2 %580 }
 0x211   : > { %v681_v39 = vpop.permute.xlu0 %680  ;;  %v636_v40 = vsel %vm377_vm1, %v633_v38, %v635_v28  ;;  %v637_v41 = vsel %vm377_vm1, %v635_v28, %v633_v38 }
 0x212   : > { %v682_v43 = vsel %vm442_vm3, %v679_v7, %v681_v39  ;;  %v683_v44 = vsel %vm442_vm3, %v681_v39, %v679_v7  ;;  %v644_v45 = vmul.f32 %v640_v33, %v637_v41  ;;  %v645_v46 = vmul.f32 %v641_v35, %v636_v40 }
 0x213   : > { %v690_v47 = vmul.f32 %v686_v36, %v682_v43  ;;  %v691_v34 = vmul.f32 %v687_v37, %v683_v44  ;;  %v587_v7 = vperm.slane %v584_v60, 1 }
 0x214   : > { %v648_v48 = vrot.slane %v644_v45, 4  ;;  %v649_v49 = vrot.slane %v645_v46, 4 }
 0x215   : > { %692 = vst [vmem:[#allocation2 + $0x8] sm:$0xf] %v690_v47 }
 0x216   : > { %693 = vst [vmem:[#allocation2 + $0x20] sm:$0xf] %v691_v34  ;;  %v737_v2 = vld [vmem:[#allocation2 + $0x48] sm:$0xff] }
 0x217   : > { %652 = vst [vmem:[#allocation2 + $0x18] sm:$0xf0] %v648_v48  ;;  %v738_v4 = vld [vmem:[#allocation2 + $0x28] sm:$0xff] }
 0x218   : > { %653 = vst [vmem:[#allocation2 + $0x10] sm:$0xf0] %v649_v49  ;;  %v597_v54 = vpop.permute.xlu1 %596 }
 0x219   : > { %v595_v55 = vpop.permute.xlu0 %594 }
 0x21a   : > { %v598_v56 = vsel %vm325_vm0, %v595_v55, %v597_v54  ;;  %v599_v57 = vsel %vm325_vm0, %v597_v54, %v595_v55 }
 0x21b   : > { %v606_v58 = vmul.f32 %v602_v52, %v599_v57  ;;  %v607_v59 = vmul.f32 %v603_v53, %v598_v56 }
 0x21c   : > { %v739_v61 = vld [vmem:[#allocation2 + $0x8] sm:$0xff] }
 0x21d   : > { %v610_v63 = vrot.slane %v606_v58, 4  ;;  %v611_v0 = vrot.slane %v607_v59, 4  ;;  %770 = vmatpush.msra.mxu2 %v739_v61  ;;  %v740_v1 = vld [vmem:[#allocation2 + $0x20] sm:$0xff] }
 0x21e   : > { %790 = vmatpush.msra.mxu3 %v740_v1 }
 0x21f   : > { %614 = vst [vmem:[#allocation2 + $0x30] sm:$0xf0] %v610_v63  ;;  %771 = vmatpush.msra.mxu2 %v737_v2 }
 0x220   : > { %615 = vst [vmem:[#allocation2] sm:$0xf0] %v611_v0  ;;  %791 = vmatpush.msra.mxu3 %v738_v4  ;;  %v579_v9 = vpop.permute.xlu1 %578 }
 0x221   : > { %v619_v10 = vpop.permute.xlu0 %618  ;;  %v582_v11 = vsel %vm303_vm5, %v579_v9, %v581_v8  ;;  %v583_v12 = vsel %vm303_vm5, %v581_v8, %v579_v9 }
 0x222   : > { %v620_v13 = vsel %vm354_vm7, %v617_v51, %v619_v10  ;;  %v621_v14 = vsel %vm354_vm7, %v619_v10, %v617_v51  ;;  %v590_v15 = vmul.f32 %v586_v3, %v583_v12  ;;  %v591_v18 = vmul.f32 %v587_v7, %v582_v11 }
 0x223   : > { %v628_v16 = vmul.f32 %v624_v5, %v621_v14  ;;  %v629_v17 = vmul.f32 %v625_v6, %v620_v13 }
 0x224   : > { %592 = vst [vmem:[#allocation2 + $0x30] sm:$0xf] %v590_v15 }
 0x225   : > { %630 = vst [vmem:[#allocation2 + $0x18] sm:$0xf] %v628_v16 }
 0x226   : > { %631 = vst [vmem:[#allocation2 + $0x10] sm:$0xf] %v629_v17 }
 0x227   : > { %593 = vst [vmem:[#allocation2] sm:$0xf] %v591_v18 }
 0x229   : > { %v747_v24 = vpop.permute.xlu0 %746 }
 0x22b   : > { %v733_v23 = vld [vmem:[#allocation2 + $0x30] sm:$0xff] }
 0x22c   : > { %v735_v19 = vld [vmem:[#allocation2 + $0x18] sm:$0xff] }
 0x22d   : > { %772 = vmatpush.msra.mxu2 %v735_v19  ;;  %v736_v20 = vld [vmem:[#allocation2 + $0x10] sm:$0xff] }
 0x22e   : > { %792 = vmatpush.msra.mxu3 %v736_v20  ;;  %v734_v22 = vld [vmem:[#allocation2] sm:$0xff] }
 0x22f   : > { %773 = vmatpush.msra.mxu2 %v733_v23 }
 0x230   : > { %793 = vmatpush.msra.mxu3 %v734_v22  ;;  %927 = vmatmul.msk.f32.vlgmr.msra.gmra.mxu2 %vm525_vm9, %v732_v21 }
 0x231   : > { %929 = vmatmul.msk.f32.vlgmr.msra.gmra.mxu3 %vm525_vm9, %v732_v21 }
 0x2b3   : > { %v775_v25 = vpop.f32.mrf.mxu2 }
 0x2b4   : > { %v795_v26 = vpop.f32.mrf.mxu3  ;;  %v776_v28 = vadd.f32 %v775_v25, %v747_v24 }
 0x2b5   : > { %v796_v29 = vadd.f32 %v795_v26, %v747_v24 }
 0x2b6   : > { %v804_v32 = vadd.f32 %v800_v30, %v776_v28 }
 0x2b7   : > { %v805_v31 = vadd.f32 %v801_v27, %v796_v29 }
 0x2b9   : > { %v808_v33 = vrot.slane %v805_v31, 4 }
 0x2bb   : > { %v809_v35 = vsel %vm529_vm8, %v804_v32, %v808_v33 }
 0x2bc   : > { %811 = vst [vmem:[%s286_s25] sm:$0xff] %v809_v35 }
 0x2bd   : > { %1094 = shalt.err (!%p1091_p9)
}
 0x2be   : > { %943 = dma.vmem_to_hbm [thread:$0]  (%p1246_p13), %s827_s19, 128, %s829_s26, %s813_s28  }
 0x2bf PF: > { %s840_s17 = sand.u32 1, %s1125_s21   ;;  %p1469_p10 = scmp.ge.s32.totalorder %s1137_s24, 2 }
 0x2c0   : > { %s841_s9 = scalar_lea.sflag [#allocation5], %s840_s17 }
 0x2c1   : > { %p954_p11 = pnand %p1469_p10, %p1251_p4 }
 0x2c3   : > { %p955_p0 = pneg %p954_p11 }
 0x2c5   : > { %1120 = dma.done.wait (%p955_p0), %s841_s9, 128  }
 0x2c6   : > { %1122 = vsyncadd (%p955_p0), %s841_s9, 4294967168  ;;  %p20_p2 = scmp.ge.s32.totalorder %s1226_s11, 4   ;;  %s1470_s21 = smov %s1129_s22 }
 0x2c7   : > { %s1471_s22 = smov %s1133_s23  ;;  %s1472_s23 = smov %s1238_s14 }
 0x2c8   : > { %s1473_s24 = smov %s1226_s11  ;;  %22 = sbr.rel (!%p20_p2) target bundleno = 6 (0x6), region = 101 }
 0x2cd   :  { %847 = vsyncpa [#allocation4], 1 }
 0x2ce   :  { %849 = vsyncpa [#allocation4 + $0x1], 1 }
 0x2cf   :  { %850 = vsyncpa [#allocation7], 1 }
 0x2d0   :  { %852 = vsyncpa [#allocation7 + $0x1], 1 }
 0x2d1   :  { %853 = vsyncpa [#allocation5], 1 }
 0x2d2   :  { %855 = vsyncpa [#allocation5 + $0x1], 1 }

</bundles_post_ra>
